<compile_context>
chip_gen: v5e
topology: v5e:2x2
jax: 0.10.0
libtpu: 0.0.40
codegen_flags: <defaults>
</compile_context>

<pallas_src>
import jax
import jax.numpy as jnp
from jax.experimental import pallas as pl
from jax.experimental.pallas import tpu as pltpu


def _round_up(x, m):
    return (x + m - 1) // m * m


def apt_kernel(x_ref, w1_ref, b1_ref, w2_ref, b2_ref, o_ref):
    x = x_ref[...]                                                   # (TM, P*nin)
    # Linear 1 + LeakyReLU (negative_slope = 0.01, PyTorch default).
    h = jnp.dot(x, w1_ref[...], preferred_element_type=jnp.float32) + b1_ref[...]
    h = jnp.where(h > 0, h, 0.01 * h)
    # Linear 2 (keep the f32 accumulator, no downcast between the two matmuls).
    z = jnp.dot(h, w2_ref[...].astype(jnp.float32),
                preferred_element_type=jnp.float32) + b2_ref[...]
    # Sigmoid: exp hits the EUP; approx reciprocal also lowers to the EUP (vrcp),
    # keeping VALU slots free.
    o_ref[...] = pl.reciprocal(1.0 + jnp.exp(-z), approx=True).astype(o_ref.dtype)


def apt_forward(x, w1, b1, w2, b2, *, tile_rows=512):
    """x: [..., nin] -> [..., nout]   (w1: [nin, nout] pre-transposed, w2: [nout, nout])"""
    nin = x.shape[-1]
    nout = w1.shape[-1]
    lead = x.shape[:-1]
    xf = x.reshape(-1, nin)
    rows = xf.shape[0]

    # Lane packing: put `pack` logical rows on the 128-lane axis via
    # block-diagonal weights so all loads / stores / matmuls are lane-dense.
    if nin == nout and 128 % nin == 0:
        pack = 128 // nin
    else:
        pack = 1  # fall back to the plain layout for odd feature widths

    if pack > 1:
        w1p = jnp.kron(jnp.eye(pack, dtype=w1.dtype), w1)            # (P*nin, P*nout)
        w2p = jnp.kron(jnp.eye(pack, dtype=w2.dtype), w2)            # (P*nout, P*nout)
    else:
        w1p, w2p = w1, w2
    b1p = jnp.tile(b1, pack).reshape(1, pack * nout)
    b2p = jnp.tile(b2, pack).reshape(1, pack * nout)

    # Tile sizing: big tiles to amortize per-grid-step overhead, but clamp for
    # small inputs; always a multiple of 8 (sublane).  512x128 f32 = 256 KiB per
    # tile, comfortably inside v7x's smaller VMEM even when double-buffered.
    rows_packed = -(-rows // pack)
    tile = _round_up(min(tile_rows, _round_up(rows_packed, 8)), 8)
    rows_packed_p = _round_up(rows_packed, tile)

    total_rows = rows_packed_p * pack
    if total_rows != rows:
        xf = jnp.pad(xf, ((0, total_rows - rows), (0, 0)))
    xp = xf.reshape(rows_packed_p, pack * nin)

    out = pl.pallas_call(
        apt_kernel,
        out_shape=jax.ShapeDtypeStruct((rows_packed_p, pack * nout), x.dtype),
        grid_spec=pl.GridSpec(
            grid=(rows_packed_p // tile,),
            in_specs=[
                pl.BlockSpec((tile, pack * nin), lambda i: (i, 0)),          # x tile
                pl.BlockSpec((pack * nin, pack * nout), lambda i: (0, 0)),   # W1 (full)
                pl.BlockSpec((1, pack * nout), lambda i: (0, 0)),            # b1
                pl.BlockSpec((pack * nout, pack * nout), lambda i: (0, 0)),  # W2 (full)
                pl.BlockSpec((1, pack * nout), lambda i: (0, 0)),            # b2
            ],
            out_specs=pl.BlockSpec((tile, pack * nout), lambda i: (i, 0)),
        ),
        compiler_params=pltpu.CompilerParams(
            dimension_semantics=("parallel",)),
    )(xp, w1p, b1p, w2p, b2p)

    out = out.reshape(rows_packed_p * pack, nout)[:rows]
    return out.reshape(*lead, nout)


def init_apt_params(key, nin, nout, dtype=jnp.float32):
    """Deterministic init mimicking nn.Linear defaults (uniform +-1/sqrt(fan_in)).
    Weights returned pre-transposed to [in, out]."""
    k1, k2, k3, k4 = jax.random.split(key, 4)
    lim1 = 1.0 / jnp.sqrt(nin)
    lim2 = 1.0 / jnp.sqrt(nout)
    w1 = jax.random.uniform(k1, (nin, nout), dtype, -lim1, lim1)
    b1 = jax.random.uniform(k2, (nout,), dtype, -lim1, lim1)
    w2 = jax.random.uniform(k3, (nout, nout), dtype, -lim2, lim2)
    b2 = jax.random.uniform(k4, (nout,), dtype, -lim2, lim2)
    return w1, b1, w2, b2


if __name__ == "__main__":
    key = jax.random.PRNGKey(0)
    kx, kp = jax.random.split(key)

    B, S, NIN, NOUT = 2, 8, 32, 32
    x = jax.random.normal(kx, (B, S, NIN), jnp.float32)
    w1, b1, w2, b2 = init_apt_params(kp, NIN, NOUT)

    out = apt_forward(x, w1, b1, w2, b2)
    out = jax.block_until_ready(out)

    # Reference check in plain JAX.
    h_ref = x @ w1 + b1
    h_ref = jnp.where(h_ref > 0, h_ref, 0.01 * h_ref)
    ref = jax.nn.sigmoid(h_ref @ w2 + b2)
    assert out.shape == (B, S, NOUT)
    # approx=True reciprocal (EUP vrcp) is slightly looser than exact divide.
    assert jnp.allclose(out, ref, atol=2e-3), "mismatch vs reference"

    print("KERNEL_OK")
</pallas_src>

<mosaic_0001>
module attributes {stable_mosaic.version = 11 : i64} {
  func.func @apt_kernel(%arg0: i32, %arg1: memref<8x128xf32, #tpu.memory_space<vmem>>, %arg2: memref<128x128xf32, #tpu.memory_space<vmem>>, %arg3: memref<1x128xf32, #tpu.memory_space<vmem>>, %arg4: memref<128x128xf32, #tpu.memory_space<vmem>>, %arg5: memref<1x128xf32, #tpu.memory_space<vmem>>, %arg6: memref<8x128xf32, #tpu.memory_space<vmem>>) attributes {dimension_semantics = [#tpu.dimension_semantics<parallel>], iteration_bounds = array<i64: 1>, scalar_prefetch = 0 : i64, scratch_operands = 0 : i64, tpu.core_type = #tpu.core_type<tc>, window_params = [{transform_indices = @transform_0, window_bounds = array<i64: 8, 128>}, {pipeline_mode = #tpu.pipeline_mode<synchronous>, transform_indices = @transform_1, window_bounds = array<i64: 128, 128>}, {pipeline_mode = #tpu.pipeline_mode<synchronous>, transform_indices = @transform_2, window_bounds = array<i64: 1, 128>}, {pipeline_mode = #tpu.pipeline_mode<synchronous>, transform_indices = @transform_3, window_bounds = array<i64: 128, 128>}, {pipeline_mode = #tpu.pipeline_mode<synchronous>, transform_indices = @transform_4, window_bounds = array<i64: 1, 128>}, {transform_indices = @transform_5, window_bounds = array<i64: 8, 128>}]} {
    %c0 = arith.constant 0 : index
    %c0_0 = arith.constant 0 : index
    %0 = vector.load %arg1[%c0, %c0_0] : memref<8x128xf32, #tpu.memory_space<vmem>>, vector<8x128xf32>
    %c0_1 = arith.constant 0 : index
    %c0_2 = arith.constant 0 : index
    %1 = vector.load %arg2[%c0_1, %c0_2] : memref<128x128xf32, #tpu.memory_space<vmem>>, vector<128x128xf32>
    %cst = arith.constant dense<0.000000e+00> : vector<8x128xf32>
    %2 = tpu.matmul %0, %1, %cst {dimension_numbers = #tpu.dot_dimension_numbers<[1], [0], [0], [1], [0, 0, 1, 1], [], []>} : vector<8x128xf32>, vector<128x128xf32>, vector<8x128xf32> -> vector<8x128xf32>
    %c0_3 = arith.constant 0 : index
    %c0_4 = arith.constant 0 : index
    %3 = vector.load %arg3[%c0_3, %c0_4] : memref<1x128xf32, #tpu.memory_space<vmem>>, vector<1x128xf32>
    %4 = vector.broadcast %3 : vector<1x128xf32> to vector<8x128xf32>
    %5 = arith.addf %2, %4 : vector<8x128xf32>
    %cst_5 = arith.constant 0.000000e+00 : f32
    %6 = vector.broadcast %cst_5 : f32 to vector<8x128xf32>
    %7 = arith.cmpf ogt, %5, %6 : vector<8x128xf32>
    %cst_6 = arith.constant 0.00999999977 : f32
    %8 = vector.broadcast %cst_6 : f32 to vector<8x128xf32>
    %9 = arith.mulf %8, %5 : vector<8x128xf32>
    %10 = arith.select %7, %5, %9 : vector<8x128xi1>, vector<8x128xf32>
    %c0_7 = arith.constant 0 : index
    %c0_8 = arith.constant 0 : index
    %11 = vector.load %arg4[%c0_7, %c0_8] : memref<128x128xf32, #tpu.memory_space<vmem>>, vector<128x128xf32>
    %cst_9 = arith.constant dense<0.000000e+00> : vector<8x128xf32>
    %12 = tpu.matmul %10, %11, %cst_9 {dimension_numbers = #tpu.dot_dimension_numbers<[1], [0], [0], [1], [0, 0, 1, 1], [], []>} : vector<8x128xf32>, vector<128x128xf32>, vector<8x128xf32> -> vector<8x128xf32>
    %c0_10 = arith.constant 0 : index
    %c0_11 = arith.constant 0 : index
    %13 = vector.load %arg5[%c0_10, %c0_11] : memref<1x128xf32, #tpu.memory_space<vmem>>, vector<1x128xf32>
    %14 = vector.broadcast %13 : vector<1x128xf32> to vector<8x128xf32>
    %15 = arith.addf %12, %14 : vector<8x128xf32>
    %cst_12 = arith.constant 0.000000e+00 : f32
    %16 = vector.broadcast %cst_12 : f32 to vector<8x128xf32>
    %17 = arith.subf %16, %15 : vector<8x128xf32>
    %18 = math.exp %17 : vector<8x128xf32>
    %cst_13 = arith.constant 1.000000e+00 : f32
    %19 = vector.broadcast %cst_13 : f32 to vector<8x128xf32>
    %20 = arith.addf %19, %18 : vector<8x128xf32>
    %21 = tpu.reciprocal %20 {approx = true} : vector<8x128xf32> -> vector<8x128xf32>
    %c0_14 = arith.constant 0 : index
    %c0_15 = arith.constant 0 : index
    %22 = vector.load %arg6[%c0_14, %c0_15] : memref<8x128xf32, #tpu.memory_space<vmem>>, vector<8x128xf32>
    tpu.vector_store %arg6[%c0_14, %c0_15], %21 {strides = array<i32>} : memref<8x128xf32, #tpu.memory_space<vmem>>, vector<8x128xf32>,
    return
  }
  func.func @transform_0(%arg0: i32) -> (i32, i32) {
    %c0_i32 = arith.constant 0 : i32
    %c0_i32_0 = arith.constant 0 : i32
    return %arg0, %c0_i32 : i32, i32
  }
  func.func @transform_1(%arg0: i32) -> (i32, i32) {
    %c0_i32 = arith.constant 0 : i32
    %c0_i32_0 = arith.constant 0 : i32
    %c0_i32_1 = arith.constant 0 : i32
    return %c0_i32, %c0_i32_0 : i32, i32
  }
  func.func @transform_2(%arg0: i32) -> (i32, i32) {
    %c0_i32 = arith.constant 0 : i32
    %c0_i32_0 = arith.constant 0 : i32
    %c0_i32_1 = arith.constant 0 : i32
    return %c0_i32, %c0_i32_0 : i32, i32
  }
  func.func @transform_3(%arg0: i32) -> (i32, i32) {
    %c0_i32 = arith.constant 0 : i32
    %c0_i32_0 = arith.constant 0 : i32
    %c0_i32_1 = arith.constant 0 : i32
    return %c0_i32, %c0_i32_0 : i32, i32
  }
  func.func @transform_4(%arg0: i32) -> (i32, i32) {
    %c0_i32 = arith.constant 0 : i32
    %c0_i32_0 = arith.constant 0 : i32
    %c0_i32_1 = arith.constant 0 : i32
    return %c0_i32, %c0_i32_0 : i32, i32
  }
  func.func @transform_5(%arg0: i32) -> (i32, i32) {
    %c0_i32 = arith.constant 0 : i32
    %c0_i32_0 = arith.constant 0 : i32
    return %arg0, %c0_i32 : i32, i32
  }
}

</mosaic_0001>

<bundles_post_ra>
// kernel: tpu_custom_call.1
= control target key start
LH: loop header
LB: loop body
LE: loop exit
PB: predicated region body
PF: predicated region fallthrough
CT: control target
= control target key end

     0   :  { %10 = vsyncpa [#allocation3], 0  ;;  %s342_s0 = inlined_call_operand.hbm [shape: f32[8,128], index: 0, kind: input, shape index: {}]   ;;  %s343_s1 = inlined_call_operand.hbm [shape: f32[128,128], index: 1, kind: input, shape index: {}]   ;;  %s344_s2 = inlined_call_operand.vmem [shape: f32[1,128], index: 2, kind: input, shape index: {}]   ;;  %s345_s3 = inlined_call_operand.hbm [shape: f32[128,128], index: 3, kind: input, shape index: {}]   ;;  %s346_s4 = inlined_call_operand.vmem [shape: f32[1,128], index: 4, kind: input, shape index: {}]   ;;  %s347_s5 = inlined_call_operand.hbm [shape: f32[8,128], index: 5, kind: output, shape index: {}]  }
   0x1   :  { %11 = vsyncpa [#allocation6], 0  ;;  %s28_s20 = sshll.u32 %s343_s1, 4  ;;  %s29_s20 = int_to_ptr.hbm [resolvable:$true] %s28_s20 }
   0x2   :  { %12 = vsyncpa [#allocation4], 0  ;;  %s288_s21 = smov [#allocation5]   ;;  %s18_s25 = sshll.u32 %s342_s0, 4  ;;  %s19_s25 = int_to_ptr.hbm [resolvable:$true] %s18_s25 }
   0x3   :  { %s30_s22 = sshll.u32 %s288_s21, 4  ;;  %s289_s26 = smov 128   ;;  %s31_s22 = int_to_ptr.vmem [resolvable:$true] %s30_s22 }
   0x4   :  { %s290_s27 = smov 8   ;;  %s291_s28 = smov [#allocation2]  }
   0x5   :  { %36 = dma.hbm_to_vmem [thread:$0]  %s29_s20, 2048, %s31_s22, [#allocation6], %s289_s26, %s289_s26, %s290_s27  }
   0x6   :  { %s20_s29 = sshll.u32 %s291_s28, 4  ;;  %s43_s7 = sshll.u32 %s345_s3, 4  ;;  %s21_s29 = int_to_ptr.vmem [resolvable:$true] %s20_s29  ;;  %s44_s7 = int_to_ptr.hbm [resolvable:$true] %s43_s7 }
   0x7   :  { %23 = dma.hbm_to_vmem [thread:$0]  %s19_s25, 128, %s21_s29, [#allocation3]  }
   0x8   :  { %s292_s1 = smov [#allocation7]  }
   0x9   :  { %s45_s8 = sshll.u32 %s292_s1, 4  ;;  %s46_s8 = int_to_ptr.vmem [resolvable:$true] %s45_s8 }
   0xa   :  { %51 = dma.hbm_to_vmem [thread:$0]  %s44_s7, 2048, %s46_s8, [#allocation6], %s289_s26, %s289_s26, %s290_s27  }
   0xb   :  { %282 = dma.done.wait [#allocation3], 128  }
   0xc   :  { %283 = vsyncadd [#allocation3], 4294967168 }
   0xd   :  { %284 = dma.done.wait [#allocation6], 4096  }
   0xe   :  { %285 = vsyncadd [#allocation6], 4294963200  ;;  %v82_v0 = vld [vmem:[#allocation5 + $0x78] sm:$0xff]  ;;  %v81_v1 = vld [vmem:[#allocation5 + $0x70] sm:$0xff]  ;;  %s293_s11 = smov [#allocation8]   ;;  %s163_s14 = sshll.u32 %s347_s5, 4  ;;  %s164_s14 = int_to_ptr.hbm [resolvable:$true] %s163_s14 }
   0xf   :  { %87 = vmatpush.msra.mxu0 %v82_v0  ;;  %v80_v2 = vld [vmem:[#allocation5 + $0x68] sm:$0xff]  ;;  %v79_v3 = vld [vmem:[#allocation5 + $0x60] sm:$0xff]  ;;  %v125_v4 = vld [vmem:[#allocation7 + $0x78] sm:$0xff] }
  0x10   :  { %v78_v5 = vld [vmem:[#allocation5 + $0x58] sm:$0xff]  ;;  %130 = vmatpush.msra.mxu1 %v125_v4  ;;  %v124_v6 = vld [vmem:[#allocation7 + $0x70] sm:$0xff]  ;;  %v123_v7 = vld [vmem:[#allocation7 + $0x68] sm:$0xff] }
  0x11   :  { %88 = vmatpush.msra.mxu0 %v81_v1  ;;  %v77_v8 = vld [vmem:[#allocation5 + $0x50] sm:$0xff]  ;;  %v122_v9 = vld [vmem:[#allocation7 + $0x60] sm:$0xff]  ;;  %v76_v10 = vld [vmem:[#allocation5 + $0x48] sm:$0xff] }
  0x12   :  { %131 = vmatpush.msra.mxu1 %v124_v6  ;;  %v121_v11 = vld [vmem:[#allocation7 + $0x58] sm:$0xff]  ;;  %v75_v12 = vld [vmem:[#allocation5 + $0x40] sm:$0xff]  ;;  %v120_v13 = vld [vmem:[#allocation7 + $0x50] sm:$0xff] }
  0x13   :  { %89 = vmatpush.msra.mxu0 %v80_v2  ;;  %v74_v14 = vld [vmem:[#allocation5 + $0x38] sm:$0xff]  ;;  %v119_v15 = vld [vmem:[#allocation7 + $0x48] sm:$0xff]  ;;  %v73_v16 = vld [vmem:[#allocation5 + $0x30] sm:$0xff] }
  0x14   :  { %132 = vmatpush.msra.mxu1 %v123_v7  ;;  %v118_v17 = vld [vmem:[#allocation7 + $0x40] sm:$0xff]  ;;  %v72_v18 = vld [vmem:[#allocation5 + $0x28] sm:$0xff]  ;;  %v117_v19 = vld [vmem:[#allocation7 + $0x38] sm:$0xff] }
  0x15   :  { %90 = vmatpush.msra.mxu0 %v79_v3  ;;  %v71_v20 = vld [vmem:[#allocation5 + $0x20] sm:$0xff]  ;;  %v116_v21 = vld [vmem:[#allocation7 + $0x30] sm:$0xff]  ;;  %v70_v22 = vld [vmem:[#allocation5 + $0x18] sm:$0xff] }
  0x16   :  { %133 = vmatpush.msra.mxu1 %v122_v9  ;;  %v115_v23 = vld [vmem:[#allocation7 + $0x28] sm:$0xff]  ;;  %v69_v24 = vld [vmem:[#allocation5 + $0x10] sm:$0xff]  ;;  %v114_v25 = vld [vmem:[#allocation7 + $0x20] sm:$0xff] }
  0x17   :  { %91 = vmatpush.msra.mxu0 %v78_v5  ;;  %v68_v26 = vld [vmem:[#allocation5 + $0x8] sm:$0xff]  ;;  %v113_v27 = vld [vmem:[#allocation7 + $0x18] sm:$0xff]  ;;  %v67_v28 = vld [vmem:[#allocation5] sm:$0xff] }
  0x18   :  { %134 = vmatpush.msra.mxu1 %v121_v11  ;;  %v66_v29 = vld [vmem:[#allocation2] sm:$0xff]  ;;  %v112_v30 = vld [vmem:[#allocation7 + $0x10] sm:$0xff]  ;;  %v111_v31 = vld [vmem:[#allocation7 + $0x8] sm:$0xff] }
  0x19   :  { %92 = vmatpush.msra.mxu0 %v77_v8  ;;  %v110_v32 = vld [vmem:[#allocation7] sm:$0xff]  ;;  %v180_v33 = vld [vmem:[%s344_s2] ss:$0 sm:$0xff]  ;;  %s161_s2 = sshll.u32 %s293_s11, 4  ;;  %s162_s2 = int_to_ptr.vmem [resolvable:$true] %s161_s2 }
  0x1a   :  { %135 = vmatpush.msra.mxu1 %v120_v13  ;;  %v181_v38 = vld [vmem:[%s346_s4] ss:$0 sm:$0xff] }
  0x1b   :  { %93 = vmatpush.msra.mxu0 %v76_v10 }
  0x1c   :  { %136 = vmatpush.msra.mxu1 %v119_v15 }
  0x1d   :  { %94 = vmatpush.msra.mxu0 %v75_v12 }
  0x1e   :  { %137 = vmatpush.msra.mxu1 %v118_v17 }
  0x1f   :  { %95 = vmatpush.msra.mxu0 %v74_v14 }
  0x20   :  { %138 = vmatpush.msra.mxu1 %v117_v19 }
  0x21   :  { %96 = vmatpush.msra.mxu0 %v73_v16 }
  0x22   :  { %139 = vmatpush.msra.mxu1 %v116_v21 }
  0x23   :  { %97 = vmatpush.msra.mxu0 %v72_v18 }
  0x24   :  { %140 = vmatpush.msra.mxu1 %v115_v23 }
  0x25   :  { %98 = vmatpush.msra.mxu0 %v71_v20 }
  0x26   :  { %141 = vmatpush.msra.mxu1 %v114_v25 }
  0x27   :  { %99 = vmatpush.msra.mxu0 %v70_v22 }
  0x28   :  { %142 = vmatpush.msra.mxu1 %v113_v27 }
  0x29   :  { %100 = vmatpush.msra.mxu0 %v69_v24 }
  0x2a   :  { %143 = vmatpush.msra.mxu1 %v112_v30 }
  0x2b   :  { %101 = vmatpush.msra.mxu0 %v68_v26 }
  0x2c   :  { %144 = vmatpush.msra.mxu1 %v111_v31 }
  0x2d   :  { %102 = vmatpush.msra.mxu0 %v67_v28 }
  0x2e   :  { %103 = vmatmul.f32.vlgmr.msra.gmra.mxu0 %v66_v29  ;;  %145 = vmatpush.msra.mxu1 %v110_v32 }
  0xab   :  { %v104_v34 = vpop.f32.mrf.mxu0 }
  0xac   :  { %v105_v35 = vadd.f32 %v180_v33, %v104_v34 }
  0xae   :  { %vm107_vm0 = vcmp.gt.f32.partialorder %v105_v35, 0.0  ;;  %v108_v36 = vmul.f32 0.01, %v105_v35 }
  0xb0   :  { %v109_v37 = vsel %vm107_vm0, %v105_v35, %v108_v36 }
  0xb1   :  { %146 = vmatmul.f32.vlgmr.msra.gmra.mxu1 %v109_v37 }
 0x12e   :  { %v147_v39 = vpop.f32.mrf.mxu1 }
 0x12f   :  { %v148_v40 = vadd.f32 %v181_v38, %v147_v39 }
 0x131   :  { %v150_v41 = vsub.f32 0.0, %v148_v40 }
 0x133   :  { %v151_v42 = vmul.f32 1.442695, %v150_v41 }
 0x135   :  { %182 = vpow2.f32 %v151_v42 }
 0x13b   :  { %v183_v43 = vpop.eup %182 }
 0x13c   :  { %v153_v44 = vadd.f32 1.0, %v183_v43 }
 0x13e   :  { %184 = vrcp.f32 %v153_v44 }
 0x144   :  { %v185_v45 = vpop.eup %184 }
 0x145   :  { %155 = vst [vmem:[#allocation8] sm:$0xff] %v185_v45 }
 0x146   :  { %166 = dma.vmem_to_hbm [thread:$0]  %s162_s2, 128, %s164_s14, [#allocation4]  }
 0x147   :  { %286 = dma.done.wait [#allocation4], 128  }
 0x148   :  { %287 = vsyncadd [#allocation4], 4294967168 }
 0x149   :  { %171 = vsyncpa [#allocation3], 1 }
 0x14a   :  { %172 = vsyncpa [#allocation6], 1 }
 0x14b   :  { %173 = vsyncpa [#allocation4], 1 }

</bundles_post_ra>
